<compile_context>
chip_gen: v5e
topology: v5e:2x2
jax: 0.10.0
libtpu: 0.0.40
codegen_flags: <defaults>
</compile_context>

<pallas_src>
import jax
import jax.numpy as jnp
from jax.experimental import pallas as pl
from jax.experimental.pallas import tpu as pltpu

NUM_LAYERS = 12    # fc1 .. fc12
NUM_STYLES = 18    # 8 loop layers * 2 + fc12 * 2


def _lrelu(x, slope=0.2):
    # F.leaky_relu(x, 0.2) in the PyTorch module.
    return jnp.where(x > 0, x, slope * x)


def make_kernel(fused: bool):
    """Build the kernel.  `fused=True` requires Z % 128 == 0 (lane-aligned
    slicing of the [TB, 2Z] result); otherwise fc4..fc11 arrive pre-split."""

    def kernel(z_ref, ws_ref, bs_ref, wb_ref, bb_ref, out_ref):
        # z_ref   : [TB, Z]                 f32
        # ws_ref  : [4, Z, Z]               bf16  fc1,fc2,fc3 (zero-padded), fc12
        # bs_ref  : [4, 1, Z]               f32
        # wb_ref  : [8, Z, 2Z] or [16,Z,Z]  bf16  fc4..fc11 (fused or split)
        # bb_ref  : [8, 1, 2Z] or [16,1,Z]  f32
        # out_ref : [TB, 9*Z]               f32   flat lane-dense styles
        Z = ws_ref.shape[-1]
        cdt = ws_ref.dtype

        def dense(xc, w_ref, b_ref, idx):
            # MXU matmul in the weight dtype, f32 accumulation; bias add in f32.
            return (jnp.dot(xc, w_ref[idx], preferred_element_type=jnp.float32)
                    + b_ref[idx])

        x = z_ref[...]

        # fc1, fc2, fc3 (dropout == identity at inference).  fc1/fc2 are padded
        # to [Z, Z]; padded weight columns/rows and biases are zero and
        # leaky_relu(0) == 0, so the math matches the unpadded network exactly.
        x = _lrelu(dense(x.astype(cdt), ws_ref, bs_ref, 0))
        x = _lrelu(dense(x.astype(cdt), ws_ref, bs_ref, 1))
        x = _lrelu(dense(x.astype(cdt), ws_ref, bs_ref, 2))

        # fc4 .. fc11
        for k in range(8):
            xc = x.astype(cdt)                      # hoisted: one cast feeds both uses
            if fused:
                y = dense(xc, wb_ref, bb_ref, k)    # [TB, 2Z], one dot per layer
                s = y[:, Z:]                        # lane-aligned (Z % 128 == 0)
                x_new = y[:, :Z]
            else:
                x_new = dense(xc, wb_ref, bb_ref, 2 * k)      # x-part   [TB, Z]
                s = dense(xc, wb_ref, bb_ref, 2 * k + 1)      # s-part   [TB, Z]
            out_ref[:, k * Z:(k + 1) * Z] = s       # one dense store per layer
            x = _lrelu(x_new)

        # fc12 -> final style slab
        out_ref[:, 8 * Z:9 * Z] = dense(x.astype(cdt), ws_ref, bs_ref, 3)

    return kernel


def _param_spec(block_shape, index_map):
    """Grid-invariant parameter BlockSpec.  Single-buffered: the same block is
    revisited every grid step, so double-buffering only wastes VMEM (v7x-critical
    with only 64 MiB)."""
    try:
        return pl.BlockSpec(block_shape, index_map, pipeline_mode=pl.Buffered(1))
    except TypeError:   # older BlockSpec without pipeline_mode kwarg
        return pl.BlockSpec(block_shape, index_map)


def pack_params(weights, biases, z_size, *, weight_dtype=jnp.bfloat16, fused=None):
    """Pack the 12 nn.Linear layers into 4 kernel inputs.

    weights[i] : [fin, fout] (already transposed vs. torch, i.e. x @ W + b)
    biases[i]  : [fout]

    Returns ((ws, bs, wb, bb), fused):
      ws [4, Z, Z]   fc1, fc2, fc3 (zero-padded to [Z, Z]), fc12   (weight_dtype)
      bs [4, 1, Z]   matching biases (zero-padded)                 (f32)
      wb fc4..fc11:  fused -> [8, Z, 2Z]; split -> [16, Z, Z] (x-part, s-part)
      bb fused -> [8, 1, 2Z]; split -> [16, 1, Z]
    """
    Z = z_size
    if fused is None:
        fused = (Z % 128 == 0)

    def pad_mat(w):
        fin, fout = w.shape
        return jnp.pad(w, ((0, Z - fin), (0, Z - fout)))

    def pad_vec(b):
        return jnp.pad(b, (0, Z - b.shape[0]))

    small_w = [pad_mat(weights[0]), pad_mat(weights[1]), pad_mat(weights[2]), weights[11]]
    small_b = [pad_vec(biases[0]), pad_vec(biases[1]), pad_vec(biases[2]), biases[11]]

    if fused:
        big_w = [weights[i] for i in range(3, 11)]     # [Z, 2Z]
        big_b = [biases[i] for i in range(3, 11)]      # [2Z]
    else:
        big_w, big_b = [], []
        for i in range(3, 11):
            w, b = weights[i], biases[i]
            big_w += [w[:, :Z], w[:, Z:]]              # x-part, s-part
            big_b += [b[:Z], b[Z:]]

    ws = jnp.stack(small_w, axis=0).astype(weight_dtype)             # [4, Z, Z]
    bs = jnp.stack(small_b, axis=0)[:, None, :].astype(jnp.float32)  # [4, 1, Z]
    wb = jnp.stack(big_w, axis=0).astype(weight_dtype)
    bb = jnp.stack(big_b, axis=0)[:, None, :].astype(jnp.float32)
    return (ws, bs, wb, bb), fused


def _choose_batch_tile(B, batch_tile):
    """Pick the batch tile: prefer >= 2 grid steps (v7x megacore), a multiple of
    8 sublanes, and a divisor of B; fall back to a single full-batch step."""
    tb = min(batch_tile, B)
    if B >= 16:
        tb = min(tb, B // 2)
    if tb >= 8:
        tb = (tb // 8) * 8
        while tb > 8 and B % tb != 0:
            tb -= 8
    if tb < 8 or B % tb != 0:
        tb = B
    return tb


def latent_generator_forward(z, params, *, fused, batch_tile=256):
    ws, bs, wb, bb = params
    B, Z = z.shape
    assert Z % 4 == 0
    half = Z // 2
    flat_out = NUM_STYLES * half            # == 9 * Z
    n_small = ws.shape[0]
    n_big, _, wide = wb.shape

    tb = _choose_batch_tile(B, batch_tile)
    grid = (B // tb,)

    flops = 2 * B * (n_small * Z * Z + n_big * Z * wide)
    bytes_accessed = (sum(a.size * a.dtype.itemsize for a in (z, ws, bs, wb, bb))
                      + B * flat_out * 4)

    # VMEM budget: single-buffered params + double-buffered z/out tiles
    # + rough headroom for live activations; clamp to a safe scoped range.
    vmem_bytes = (ws.size * ws.dtype.itemsize
                  + wb.size * wb.dtype.itemsize
                  + (bs.shape[0] * 8 * Z + bb.shape[0] * 8 * wide) * 4  # 8-sublane pad
                  + 2 * tb * Z * z.dtype.itemsize
                  + 2 * tb * flat_out * 4
                  + 4 * tb * wide * 4)
    vmem_limit = int(min(64 << 20, max(16 << 20, 2 * vmem_bytes)))

    out_flat = pl.pallas_call(
        make_kernel(fused),
        grid=grid,
        in_specs=[
            pl.BlockSpec((tb, Z), lambda i: (i, 0)),                  # z (batch-tiled)
            _param_spec((n_small, Z, Z), lambda i: (0, 0, 0)),        # fc1-3, fc12 weights
            _param_spec((n_small, 1, Z), lambda i: (0, 0, 0)),        # fc1-3, fc12 biases
            _param_spec((n_big, Z, wide), lambda i: (0, 0, 0)),       # fc4-11 weights
            _param_spec((n_big, 1, wide), lambda i: (0, 0, 0)),       # fc4-11 biases
        ],
        out_specs=pl.BlockSpec((tb, flat_out), lambda i: (i, 0)),     # lane-dense flat styles
        out_shape=jax.ShapeDtypeStruct((B, flat_out), jnp.float32),
        compiler_params=pltpu.CompilerParams(
            dimension_semantics=("parallel",),
            vmem_limit_bytes=vmem_limit),
        cost_estimate=pl.CostEstimate(
            flops=flops, transcendentals=0, bytes_accessed=bytes_accessed),
    )(z, ws, bs, wb, bb)

    # Free reshape back to the PyTorch output layout (B, 18, Z/2).
    return out_flat.reshape(B, NUM_STYLES, half)


def make_params(z_size, key):
    """PyTorch nn.Linear-style deterministic init (uniform +/- 1/sqrt(fan_in))."""
    dims = [(z_size, z_size // 4),
            (z_size // 4, z_size // 2),
            (z_size // 2, z_size)]
    dims += [(z_size, 2 * z_size)] * 8          # fc4 .. fc11
    dims += [(z_size, z_size)]                  # fc12

    weights, biases = [], []
    for (fin, fout) in dims:
        key, kw, kb = jax.random.split(key, 3)
        bound = 1.0 / float(fin) ** 0.5
        weights.append(jax.random.uniform(kw, (fin, fout), jnp.float32,
                                          minval=-bound, maxval=bound))
        biases.append(jax.random.uniform(kb, (fout,), jnp.float32,
                                         minval=-bound, maxval=bound))
    return weights, biases, key


def reference_forward(z, weights, biases, compute_dtype=jnp.bfloat16):
    """Pure-JAX reference mirroring the PyTorch forward (eval mode), using the
    original unsplit/unpadded parameters and the same matmul precision."""
    Z = z.shape[1]
    half = Z // 2

    def lin(x, i):
        return (jnp.dot(x.astype(compute_dtype),
                        weights[i].astype(compute_dtype),
                        preferred_element_type=jnp.float32)
                + biases[i])

    x = _lrelu(lin(z, 0))
    x = _lrelu(lin(x, 1))
    x = _lrelu(lin(x, 2))
    styles = []
    for layer in range(3, 11):
        y = lin(x, layer)
        x_new, s = y[:, :Z], y[:, Z:]
        styles += [s[:, :half], s[:, half:]]
        x = _lrelu(x_new)
    s = lin(x, 11)
    styles += [s[:, :half], s[:, half:]]
    return jnp.stack(styles, axis=1)


if __name__ == "__main__":
    key = jax.random.PRNGKey(0)

    # Exercise both code paths: split (Z not a multiple of 128) and fused
    # (Z % 128 == 0, one [Z, 2Z] dot per loop layer).  Both use a 2-step
    # batch grid (B=16, tb=8) so the "parallel" axis is real.
    for (Z_SIZE, BATCH) in ((32, 16), (128, 16)):
        weights, biases, key = make_params(Z_SIZE, key)
        key, kz = jax.random.split(key)
        z = jax.random.normal(kz, (BATCH, Z_SIZE), jnp.float32)

        params, fused = pack_params(weights, biases, Z_SIZE,
                                    weight_dtype=jnp.bfloat16)

        out = latent_generator_forward(z, params, fused=fused)
        out = jax.block_until_ready(out)

        ref = reference_forward(z, weights, biases, compute_dtype=jnp.bfloat16)
        assert out.shape == (BATCH, NUM_STYLES, Z_SIZE // 2), out.shape
        max_err = float(jnp.max(jnp.abs(out - ref)))
        assert max_err < 5e-3, f"Z={Z_SIZE}: max abs err {max_err}"

    print("KERNEL_OK")
</pallas_src>

<mosaic_0001>
module attributes {stable_mosaic.version = 11 : i64} {
  func.func @kernel(%arg0: i32, %arg1: memref<8x32xf32, #tpu.memory_space<vmem>>, %arg2: memref<4x32x32xbf16, #tpu.memory_space<vmem>>, %arg3: memref<4x1x32xf32, #tpu.memory_space<vmem>>, %arg4: memref<16x32x32xbf16, #tpu.memory_space<vmem>>, %arg5: memref<16x1x32xf32, #tpu.memory_space<vmem>>, %arg6: memref<8x288xf32, #tpu.memory_space<vmem>>) attributes {dimension_semantics = [#tpu.dimension_semantics<parallel>], iteration_bounds = array<i64: 2>, scalar_prefetch = 0 : i64, scratch_operands = 0 : i64, tpu.core_type = #tpu.core_type<tc>, window_params = [{transform_indices = @transform_0, window_bounds = array<i64: 8, 32>}, {pipeline_mode = #tpu.pipeline_mode<synchronous>, transform_indices = @transform_1, window_bounds = array<i64: 4, 32, 32>}, {pipeline_mode = #tpu.pipeline_mode<synchronous>, transform_indices = @transform_2, window_bounds = array<i64: 4, 1, 32>}, {pipeline_mode = #tpu.pipeline_mode<synchronous>, transform_indices = @transform_3, window_bounds = array<i64: 16, 32, 32>}, {pipeline_mode = #tpu.pipeline_mode<synchronous>, transform_indices = @transform_4, window_bounds = array<i64: 16, 1, 32>}, {transform_indices = @transform_5, window_bounds = array<i64: 8, 288>}]} {
    %c0 = arith.constant 0 : index
    %c0_0 = arith.constant 0 : index
    %0 = vector.load %arg1[%c0, %c0_0] : memref<8x32xf32, #tpu.memory_space<vmem>>, vector<8x32xf32>
    %1 = arith.truncf %0 : vector<8x32xf32> to vector<8x32xbf16>
    %c0_1 = arith.constant 0 : index
    %c0_2 = arith.constant 0 : index
    %c0_3 = arith.constant 0 : index
    %2 = vector.load %arg2[%c0_1, %c0_2, %c0_3] : memref<4x32x32xbf16, #tpu.memory_space<vmem>>, vector<1x32x32xbf16>
    %3 = vector.shape_cast %2 : vector<1x32x32xbf16> to vector<32x32xbf16>
    %cst = arith.constant dense<0.000000e+00> : vector<8x32xf32>
    %4 = tpu.matmul %1, %3, %cst {dimension_numbers = #tpu.dot_dimension_numbers<[1], [0], [0], [1], [0, 0, 1, 1], [], []>} : vector<8x32xbf16>, vector<32x32xbf16>, vector<8x32xf32> -> vector<8x32xf32>
    %c0_4 = arith.constant 0 : index
    %c0_5 = arith.constant 0 : index
    %c0_6 = arith.constant 0 : index
    %5 = vector.load %arg3[%c0_4, %c0_5, %c0_6] : memref<4x1x32xf32, #tpu.memory_space<vmem>>, vector<1x1x32xf32>
    %6 = vector.shape_cast %5 : vector<1x1x32xf32> to vector<1x32xf32>
    %7 = vector.broadcast %6 : vector<1x32xf32> to vector<8x32xf32>
    %8 = arith.addf %4, %7 : vector<8x32xf32>
    %cst_7 = arith.constant 0.000000e+00 : f32
    %9 = vector.broadcast %cst_7 : f32 to vector<8x32xf32>
    %10 = arith.cmpf ogt, %8, %9 : vector<8x32xf32>
    %cst_8 = arith.constant 2.000000e-01 : f32
    %11 = vector.broadcast %cst_8 : f32 to vector<8x32xf32>
    %12 = arith.mulf %11, %8 : vector<8x32xf32>
    %13 = arith.select %10, %8, %12 : vector<8x32xi1>, vector<8x32xf32>
    %14 = arith.truncf %13 : vector<8x32xf32> to vector<8x32xbf16>
    %c1 = arith.constant 1 : index
    %c0_9 = arith.constant 0 : index
    %c0_10 = arith.constant 0 : index
    %15 = vector.load %arg2[%c1, %c0_9, %c0_10] : memref<4x32x32xbf16, #tpu.memory_space<vmem>>, vector<1x32x32xbf16>
    %16 = vector.shape_cast %15 : vector<1x32x32xbf16> to vector<32x32xbf16>
    %cst_11 = arith.constant dense<0.000000e+00> : vector<8x32xf32>
    %17 = tpu.matmul %14, %16, %cst_11 {dimension_numbers = #tpu.dot_dimension_numbers<[1], [0], [0], [1], [0, 0, 1, 1], [], []>} : vector<8x32xbf16>, vector<32x32xbf16>, vector<8x32xf32> -> vector<8x32xf32>
    %c1_12 = arith.constant 1 : index
    %c0_13 = arith.constant 0 : index
    %c0_14 = arith.constant 0 : index
    %18 = vector.load %arg3[%c1_12, %c0_13, %c0_14] : memref<4x1x32xf32, #tpu.memory_space<vmem>>, vector<1x1x32xf32>
    %19 = vector.shape_cast %18 : vector<1x1x32xf32> to vector<1x32xf32>
    %20 = vector.broadcast %19 : vector<1x32xf32> to vector<8x32xf32>
    %21 = arith.addf %17, %20 : vector<8x32xf32>
    %cst_15 = arith.constant 0.000000e+00 : f32
    %22 = vector.broadcast %cst_15 : f32 to vector<8x32xf32>
    %23 = arith.cmpf ogt, %21, %22 : vector<8x32xf32>
    %cst_16 = arith.constant 2.000000e-01 : f32
    %24 = vector.broadcast %cst_16 : f32 to vector<8x32xf32>
    %25 = arith.mulf %24, %21 : vector<8x32xf32>
    %26 = arith.select %23, %21, %25 : vector<8x32xi1>, vector<8x32xf32>
    %27 = arith.truncf %26 : vector<8x32xf32> to vector<8x32xbf16>
    %c2 = arith.constant 2 : index
    %c0_17 = arith.constant 0 : index
    %c0_18 = arith.constant 0 : index
    %28 = vector.load %arg2[%c2, %c0_17, %c0_18] : memref<4x32x32xbf16, #tpu.memory_space<vmem>>, vector<1x32x32xbf16>
    %29 = vector.shape_cast %28 : vector<1x32x32xbf16> to vector<32x32xbf16>
    %cst_19 = arith.constant dense<0.000000e+00> : vector<8x32xf32>
    %30 = tpu.matmul %27, %29, %cst_19 {dimension_numbers = #tpu.dot_dimension_numbers<[1], [0], [0], [1], [0, 0, 1, 1], [], []>} : vector<8x32xbf16>, vector<32x32xbf16>, vector<8x32xf32> -> vector<8x32xf32>
    %c2_20 = arith.constant 2 : index
    %c0_21 = arith.constant 0 : index
    %c0_22 = arith.constant 0 : index
    %31 = vector.load %arg3[%c2_20, %c0_21, %c0_22] : memref<4x1x32xf32, #tpu.memory_space<vmem>>, vector<1x1x32xf32>
    %32 = vector.shape_cast %31 : vector<1x1x32xf32> to vector<1x32xf32>
    %33 = vector.broadcast %32 : vector<1x32xf32> to vector<8x32xf32>
    %34 = arith.addf %30, %33 : vector<8x32xf32>
    %cst_23 = arith.constant 0.000000e+00 : f32
    %35 = vector.broadcast %cst_23 : f32 to vector<8x32xf32>
    %36 = arith.cmpf ogt, %34, %35 : vector<8x32xf32>
    %cst_24 = arith.constant 2.000000e-01 : f32
    %37 = vector.broadcast %cst_24 : f32 to vector<8x32xf32>
    %38 = arith.mulf %37, %34 : vector<8x32xf32>
    %39 = arith.select %36, %34, %38 : vector<8x32xi1>, vector<8x32xf32>
    %40 = arith.truncf %39 : vector<8x32xf32> to vector<8x32xbf16>
    %c0_25 = arith.constant 0 : index
    %c0_26 = arith.constant 0 : index
    %c0_27 = arith.constant 0 : index
    %41 = vector.load %arg4[%c0_25, %c0_26, %c0_27] : memref<16x32x32xbf16, #tpu.memory_space<vmem>>, vector<1x32x32xbf16>
    %42 = vector.shape_cast %41 : vector<1x32x32xbf16> to vector<32x32xbf16>
    %cst_28 = arith.constant dense<0.000000e+00> : vector<8x32xf32>
    %43 = tpu.matmul %40, %42, %cst_28 {dimension_numbers = #tpu.dot_dimension_numbers<[1], [0], [0], [1], [0, 0, 1, 1], [], []>} : vector<8x32xbf16>, vector<32x32xbf16>, vector<8x32xf32> -> vector<8x32xf32>
    %c0_29 = arith.constant 0 : index
    %c0_30 = arith.constant 0 : index
    %c0_31 = arith.constant 0 : index
    %44 = vector.load %arg5[%c0_29, %c0_30, %c0_31] : memref<16x1x32xf32, #tpu.memory_space<vmem>>, vector<1x1x32xf32>
    %45 = vector.shape_cast %44 : vector<1x1x32xf32> to vector<1x32xf32>
    %46 = vector.broadcast %45 : vector<1x32xf32> to vector<8x32xf32>
    %47 = arith.addf %43, %46 : vector<8x32xf32>
    %c1_32 = arith.constant 1 : index
    %c0_33 = arith.constant 0 : index
    %c0_34 = arith.constant 0 : index
    %48 = vector.load %arg4[%c1_32, %c0_33, %c0_34] : memref<16x32x32xbf16, #tpu.memory_space<vmem>>, vector<1x32x32xbf16>
    %49 = vector.shape_cast %48 : vector<1x32x32xbf16> to vector<32x32xbf16>
    %cst_35 = arith.constant dense<0.000000e+00> : vector<8x32xf32>
    %50 = tpu.matmul %40, %49, %cst_35 {dimension_numbers = #tpu.dot_dimension_numbers<[1], [0], [0], [1], [0, 0, 1, 1], [], []>} : vector<8x32xbf16>, vector<32x32xbf16>, vector<8x32xf32> -> vector<8x32xf32>
    %c1_36 = arith.constant 1 : index
    %c0_37 = arith.constant 0 : index
    %c0_38 = arith.constant 0 : index
    %51 = vector.load %arg5[%c1_36, %c0_37, %c0_38] : memref<16x1x32xf32, #tpu.memory_space<vmem>>, vector<1x1x32xf32>
    %52 = vector.shape_cast %51 : vector<1x1x32xf32> to vector<1x32xf32>
    %53 = vector.broadcast %52 : vector<1x32xf32> to vector<8x32xf32>
    %54 = arith.addf %50, %53 : vector<8x32xf32>
    %c0_39 = arith.constant 0 : index
    %c0_40 = arith.constant 0 : index
    %55 = vector.load %arg6[%c0_39, %c0_40] : memref<8x288xf32, #tpu.memory_space<vmem>>, vector<8x32xf32>
    tpu.vector_store %arg6[%c0_39, %c0_40], %54 {strides = array<i32>} : memref<8x288xf32, #tpu.memory_space<vmem>>, vector<8x32xf32>,
    %cst_41 = arith.constant 0.000000e+00 : f32
    %56 = vector.broadcast %cst_41 : f32 to vector<8x32xf32>
    %57 = arith.cmpf ogt, %47, %56 : vector<8x32xf32>
    %cst_42 = arith.constant 2.000000e-01 : f32
    %58 = vector.broadcast %cst_42 : f32 to vector<8x32xf32>
    %59 = arith.mulf %58, %47 : vector<8x32xf32>
    %60 = arith.select %57, %47, %59 : vector<8x32xi1>, vector<8x32xf32>
    %61 = arith.truncf %60 : vector<8x32xf32> to vector<8x32xbf16>
    %c2_43 = arith.constant 2 : index
    %c0_44 = arith.constant 0 : index
    %c0_45 = arith.constant 0 : index
    %62 = vector.load %arg4[%c2_43, %c0_44, %c0_45] : memref<16x32x32xbf16, #tpu.memory_space<vmem>>, vector<1x32x32xbf16>
    %63 = vector.shape_cast %62 : vector<1x32x32xbf16> to vector<32x32xbf16>
    %cst_46 = arith.constant dense<0.000000e+00> : vector<8x32xf32>
    %64 = tpu.matmul %61, %63, %cst_46 {dimension_numbers = #tpu.dot_dimension_numbers<[1], [0], [0], [1], [0, 0, 1, 1], [], []>} : vector<8x32xbf16>, vector<32x32xbf16>, vector<8x32xf32> -> vector<8x32xf32>
    %c2_47 = arith.constant 2 : index
    %c0_48 = arith.constant 0 : index
    %c0_49 = arith.constant 0 : index
    %65 = vector.load %arg5[%c2_47, %c0_48, %c0_49] : memref<16x1x32xf32, #tpu.memory_space<vmem>>, vector<1x1x32xf32>
    %66 = vector.shape_cast %65 : vector<1x1x32xf32> to vector<1x32xf32>
    %67 = vector.broadcast %66 : vector<1x32xf32> to vector<8x32xf32>
    %68 = arith.addf %64, %67 : vector<8x32xf32>
    %c3 = arith.constant 3 : index
    %c0_50 = arith.constant 0 : index
    %c0_51 = arith.constant 0 : index
    %69 = vector.load %arg4[%c3, %c0_50, %c0_51] : memref<16x32x32xbf16, #tpu.memory_space<vmem>>, vector<1x32x32xbf16>
    %70 = vector.shape_cast %69 : vector<1x32x32xbf16> to vector<32x32xbf16>
    %cst_52 = arith.constant dense<0.000000e+00> : vector<8x32xf32>
    %71 = tpu.matmul %61, %70, %cst_52 {dimension_numbers = #tpu.dot_dimension_numbers<[1], [0], [0], [1], [0, 0, 1, 1], [], []>} : vector<8x32xbf16>, vector<32x32xbf16>, vector<8x32xf32> -> vector<8x32xf32>
    %c3_53 = arith.constant 3 : index
    %c0_54 = arith.constant 0 : index
    %c0_55 = arith.constant 0 : index
    %72 = vector.load %arg5[%c3_53, %c0_54, %c0_55] : memref<16x1x32xf32, #tpu.memory_space<vmem>>, vector<1x1x32xf32>
    %73 = vector.shape_cast %72 : vector<1x1x32xf32> to vector<1x32xf32>
    %74 = vector.broadcast %73 : vector<1x32xf32> to vector<8x32xf32>
    %75 = arith.addf %71, %74 : vector<8x32xf32>
    %c0_56 = arith.constant 0 : index
    %c32 = arith.constant 32 : index
    %76 = vector.load %arg6[%c0_56, %c32] : memref<8x288xf32, #tpu.memory_space<vmem>>, vector<8x32xf32>
    tpu.vector_store %arg6[%c0_56, %c32], %75 {strides = array<i32>} : memref<8x288xf32, #tpu.memory_space<vmem>>, vector<8x32xf32>,
    %cst_57 = arith.constant 0.000000e+00 : f32
    %77 = vector.broadcast %cst_57 : f32 to vector<8x32xf32>
    %78 = arith.cmpf ogt, %68, %77 : vector<8x32xf32>
    %cst_58 = arith.constant 2.000000e-01 : f32
    %79 = vector.broadcast %cst_58 : f32 to vector<8x32xf32>
    %80 = arith.mulf %79, %68 : vector<8x32xf32>
    %81 = arith.select %78, %68, %80 : vector<8x32xi1>, vector<8x32xf32>
    %82 = arith.truncf %81 : vector<8x32xf32> to vector<8x32xbf16>
    %c4 = arith.constant 4 : index
    %c0_59 = arith.constant 0 : index
    %c0_60 = arith.constant 0 : index
    %83 = vector.load %arg4[%c4, %c0_59, %c0_60] : memref<16x32x32xbf16, #tpu.memory_space<vmem>>, vector<1x32x32xbf16>
    %84 = vector.shape_cast %83 : vector<1x32x32xbf16> to vector<32x32xbf16>
    %cst_61 = arith.constant dense<0.000000e+00> : vector<8x32xf32>
    %85 = tpu.matmul %82, %84, %cst_61 {dimension_numbers = #tpu.dot_dimension_numbers<[1], [0], [0], [1], [0, 0, 1, 1], [], []>} : vector<8x32xbf16>, vector<32x32xbf16>, vector<8x32xf32> -> vector<8x32xf32>
    %c4_62 = arith.constant 4 : index
    %c0_63 = arith.constant 0 : index
    %c0_64 = arith.constant 0 : index
    %86 = vector.load %arg5[%c4_62, %c0_63, %c0_64] : memref<16x1x32xf32, #tpu.memory_space<vmem>>, vector<1x1x32xf32>
    %87 = vector.shape_cast %86 : vector<1x1x32xf32> to vector<1x32xf32>
    %88 = vector.broadcast %87 : vector<1x32xf32> to vector<8x32xf32>
    %89 = arith.addf %85, %88 : vector<8x32xf32>
    %c5 = arith.constant 5 : index
    %c0_65 = arith.constant 0 : index
    %c0_66 = arith.constant 0 : index
    %90 = vector.load %arg4[%c5, %c0_65, %c0_66] : memref<16x32x32xbf16, #tpu.memory_space<vmem>>, vector<1x32x32xbf16>
    %91 = vector.shape_cast %90 : vector<1x32x32xbf16> to vector<32x32xbf16>
    %cst_67 = arith.constant dense<0.000000e+00> : vector<8x32xf32>
    %92 = tpu.matmul %82, %91, %cst_67 {dimension_numbers = #tpu.dot_dimension_numbers<[1], [0], [0], [1], [0, 0, 1, 1], [], []>} : vector<8x32xbf16>, vector<32x32xbf16>, vector<8x32xf32> -> vector<8x32xf32>
    %c5_68 = arith.constant 5 : index
    %c0_69 = arith.constant 0 : index
    %c0_70 = arith.constant 0 : index
    %93 = vector.load %arg5[%c5_68, %c0_69, %c0_70] : memref<16x1x32xf32, #tpu.memory_space<vmem>>, vector<1x1x32xf32>
    %94 = vector.shape_cast %93 : vector<1x1x32xf32> to vector<1x32xf32>
    %95 = vector.broadcast %94 : vector<1x32xf32> to vector<8x32xf32>
    %96 = arith.addf %92, %95 : vector<8x32xf32>
    %c0_71 = arith.constant 0 : index
    %c64 = arith.constant 64 : index
    %97 = vector.load %arg6[%c0_71, %c64] : memref<8x288xf32, #tpu.memory_space<vmem>>, vector<8x32xf32>
    tpu.vector_store %arg6[%c0_71, %c64], %96 {strides = array<i32>} : memref<8x288xf32, #tpu.memory_space<vmem>>, vector<8x32xf32>,
    %cst_72 = arith.constant 0.000000e+00 : f32
    %98 = vector.broadcast %cst_72 : f32 to vector<8x32xf32>
    %99 = arith.cmpf ogt, %89, %98 : vector<8x32xf32>
    %cst_73 = arith.constant 2.000000e-01 : f32
    %100 = vector.broadcast %cst_73 : f32 to vector<8x32xf32>
    %101 = arith.mulf %100, %89 : vector<8x32xf32>
    %102 = arith.select %99, %89, %101 : vector<8x32xi1>, vector<8x32xf32>
    %103 = arith.truncf %102 : vector<8x32xf32> to vector<8x32xbf16>
    %c6 = arith.constant 6 : index
    %c0_74 = arith.constant 0 : index
    %c0_75 = arith.constant 0 : index
    %104 = vector.load %arg4[%c6, %c0_74, %c0_75] : memref<16x32x32xbf16, #tpu.memory_space<vmem>>, vector<1x32x32xbf16>
    %105 = vector.shape_cast %104 : vector<1x32x32xbf16> to vector<32x32xbf16>
    %cst_76 = arith.constant dense<0.000000e+00> : vector<8x32xf32>
    %106 = tpu.matmul %103, %105, %cst_76 {dimension_numbers = #tpu.dot_dimension_numbers<[1], [0], [0], [1], [0, 0, 1, 1], [], []>} : vector<8x32xbf16>, vector<32x32xbf16>, vector<8x32xf32> -> vector<8x32xf32>
    %c6_77 = arith.constant 6 : index
    %c0_78 = arith.constant 0 : index
    %c0_79 = arith.constant 0 : index
    %107 = vector.load %arg5[%c6_77, %c0_78, %c0_79] : memref<16x1x32xf32, #tpu.memory_space<vmem>>, vector<1x1x32xf32>
    %108 = vector.shape_cast %107 : vector<1x1x32xf32> to vector<1x32xf32>
    %109 = vector.broadcast %108 : vector<1x32xf32> to vector<8x32xf32>
    %110 = arith.addf %106, %109 : vector<8x32xf32>
    %c7 = arith.constant 7 : index
    %c0_80 = arith.constant 0 : index
    %c0_81 = arith.constant 0 : index
    %111 = vector.load %arg4[%c7, %c0_80, %c0_81] : memref<16x32x32xbf16, #tpu.memory_space<vmem>>, vector<1x32x32xbf16>
    %112 = vector.shape_cast %111 : vector<1x32x32xbf16> to vector<32x32xbf16>
    %cst_82 = arith.constant dense<0.000000e+00> : vector<8x32xf32>
    %113 = tpu.matmul %103, %112, %cst_82 {dimension_numbers = #tpu.dot_dimension_numbers<[1], [0], [0], [1], [0, 0, 1, 1], [], []>} : vector<8x32xbf16>, vector<32x32xbf16>, vector<8x32xf32> -> vector<8x32xf32>
    %c7_83 = arith.constant 7 : index
    %c0_84 = arith.constant 0 : index
    %c0_85 = arith.constant 0 : index
    %114 = vector.load %arg5[%c7_83, %c0_84, %c0_85] : memref<16x1x32xf32, #tpu.memory_space<vmem>>, vector<1x1x32xf32>
    %115 = vector.shape_cast %114 : vector<1x1x32xf32> to vector<1x32xf32>
    %116 = vector.broadcast %115 : vector<1x32xf32> to vector<8x32xf32>
    %117 = arith.addf %113, %116 : vector<8x32xf32>
    %c0_86 = arith.constant 0 : index
    %c96 = arith.constant 96 : index
    %118 = vector.load %arg6[%c0_86, %c96] : memref<8x288xf32, #tpu.memory_space<vmem>>, vector<8x32xf32>
    tpu.vector_store %arg6[%c0_86, %c96], %117 {strides = array<i32>} : memref<8x288xf32, #tpu.memory_space<vmem>>, vector<8x32xf32>,
    %cst_87 = arith.constant 0.000000e+00 : f32
    %119 = vector.broadcast %cst_87 : f32 to vector<8x32xf32>
    %120 = arith.cmpf ogt, %110, %119 : vector<8x32xf32>
    %cst_88 = arith.constant 2.000000e-01 : f32
    %121 = vector.broadcast %cst_88 : f32 to vector<8x32xf32>
    %122 = arith.mulf %121, %110 : vector<8x32xf32>
    %123 = arith.select %120, %110, %122 : vector<8x32xi1>, vector<8x32xf32>
    %124 = arith.truncf %123 : vector<8x32xf32> to vector<8x32xbf16>
    %c8 = arith.constant 8 : index
    %c0_89 = arith.constant 0 : index
    %c0_90 = arith.constant 0 : index
    %125 = vector.load %arg4[%c8, %c0_89, %c0_90] : memref<16x32x32xbf16, #tpu.memory_space<vmem>>, vector<1x32x32xbf16>
    %126 = vector.shape_cast %125 : vector<1x32x32xbf16> to vector<32x32xbf16>
    %cst_91 = arith.constant dense<0.000000e+00> : vector<8x32xf32>
    %127 = tpu.matmul %124, %126, %cst_91 {dimension_numbers = #tpu.dot_dimension_numbers<[1], [0], [0], [1], [0, 0, 1, 1], [], []>} : vector<8x32xbf16>, vector<32x32xbf16>, vector<8x32xf32> -> vector<8x32xf32>
    %c8_92 = arith.constant 8 : index
    %c0_93 = arith.constant 0 : index
    %c0_94 = arith.constant 0 : index
    %128 = vector.load %arg5[%c8_92, %c0_93, %c0_94] : memref<16x1x32xf32, #tpu.memory_space<vmem>>, vector<1x1x32xf32>
    %129 = vector.shape_cast %128 : vector<1x1x32xf32> to vector<1x32xf32>
    %130 = vector.broadcast %129 : vector<1x32xf32> to vector<8x32xf32>
    %131 = arith.addf %127, %130 : vector<8x32xf32>
    %c9 = arith.constant 9 : index
    %c0_95 = arith.constant 0 : index
    %c0_96 = arith.constant 0 : index
    %132 = vector.load %arg4[%c9, %c0_95, %c0_96] : memref<16x32x32xbf16, #tpu.memory_space<vmem>>, vector<1x32x32xbf16>
    %133 = vector.shape_cast %132 : vector<1x32x32xbf16> to vector<32x32xbf16>
    %cst_97 = arith.constant dense<0.000000e+00> : vector<8x32xf32>
    %134 = tpu.matmul %124, %133, %cst_97 {dimension_numbers = #tpu.dot_dimension_numbers<[1], [0], [0], [1], [0, 0, 1, 1], [], []>} : vector<8x32xbf16>, vector<32x32xbf16>, vector<8x32xf32> -> vector<8x32xf32>
    %c9_98 = arith.constant 9 : index
    %c0_99 = arith.constant 0 : index
    %c0_100 = arith.constant 0 : index
    %135 = vector.load %arg5[%c9_98, %c0_99, %c0_100] : memref<16x1x32xf32, #tpu.memory_space<vmem>>, vector<1x1x32xf32>
    %136 = vector.shape_cast %135 : vector<1x1x32xf32> to vector<1x32xf32>
    %137 = vector.broadcast %136 : vector<1x32xf32> to vector<8x32xf32>
    %138 = arith.addf %134, %137 : vector<8x32xf32>
    %c0_101 = arith.constant 0 : index
    %c128 = arith.constant 128 : index
    %139 = vector.load %arg6[%c0_101, %c128] : memref<8x288xf32, #tpu.memory_space<vmem>>, vector<8x32xf32>
    tpu.vector_store %arg6[%c0_101, %c128], %138 {strides = array<i32>} : memref<8x288xf32, #tpu.memory_space<vmem>>, vector<8x32xf32>,
    %cst_102 = arith.constant 0.000000e+00 : f32
    %140 = vector.broadcast %cst_102 : f32 to vector<8x32xf32>
    %141 = arith.cmpf ogt, %131, %140 : vector<8x32xf32>
    %cst_103 = arith.constant 2.000000e-01 : f32
    %142 = vector.broadcast %cst_103 : f32 to vector<8x32xf32>
    %143 = arith.mulf %142, %131 : vector<8x32xf32>
    %144 = arith.select %141, %131, %143 : vector<8x32xi1>, vector<8x32xf32>
    %145 = arith.truncf %144 : vector<8x32xf32> to vector<8x32xbf16>
    %c10 = arith.constant 10 : index
    %c0_104 = arith.constant 0 : index
    %c0_105 = arith.constant 0 : index
    %146 = vector.load %arg4[%c10, %c0_104, %c0_105] : memref<16x32x32xbf16, #tpu.memory_space<vmem>>, vector<1x32x32xbf16>
    %147 = vector.shape_cast %146 : vector<1x32x32xbf16> to vector<32x32xbf16>
    %cst_106 = arith.constant dense<0.000000e+00> : vector<8x32xf32>
    %148 = tpu.matmul %145, %147, %cst_106 {dimension_numbers = #tpu.dot_dimension_numbers<[1], [0], [0], [1], [0, 0, 1, 1], [], []>} : vector<8x32xbf16>, vector<32x32xbf16>, vector<8x32xf32> -> vector<8x32xf32>
    %c10_107 = arith.constant 10 : index
    %c0_108 = arith.constant 0 : index
    %c0_109 = arith.constant 0 : index
    %149 = vector.load %arg5[%c10_107, %c0_108, %c0_109] : memref<16x1x32xf32, #tpu.memory_space<vmem>>, vector<1x1x32xf32>
    %150 = vector.shape_cast %149 : vector<1x1x32xf32> to vector<1x32xf32>
    %151 = vector.broadcast %150 : vector<1x32xf32> to vector<8x32xf32>
    %152 = arith.addf %148, %151 : vector<8x32xf32>
    %c11 = arith.constant 11 : index
    %c0_110 = arith.constant 0 : index
    %c0_111 = arith.constant 0 : index
    %153 = vector.load %arg4[%c11, %c0_110, %c0_111] : memref<16x32x32xbf16, #tpu.memory_space<vmem>>, vector<1x32x32xbf16>
    %154 = vector.shape_cast %153 : vector<1x32x32xbf16> to vector<32x32xbf16>
    %cst_112 = arith.constant dense<0.000000e+00> : vector<8x32xf32>
    %155 = tpu.matmul %145, %154, %cst_112 {dimension_numbers = #tpu.dot_dimension_numbers<[1], [0], [0], [1], [0, 0, 1, 1], [], []>} : vector<8x32xbf16>, vector<32x32xbf16>, vector<8x32xf32> -> vector<8x32xf32>
    %c11_113 = arith.constant 11 : index
    %c0_114 = arith.constant 0 : index
    %c0_115 = arith.constant 0 : index
    %156 = vector.load %arg5[%c11_113, %c0_114, %c0_115] : memref<16x1x32xf32, #tpu.memory_space<vmem>>, vector<1x1x32xf32>
    %157 = vector.shape_cast %156 : vector<1x1x32xf32> to vector<1x32xf32>
    %158 = vector.broadcast %157 : vector<1x32xf32> to vector<8x32xf32>
    %159 = arith.addf %155, %158 : vector<8x32xf32>
    %c0_116 = arith.constant 0 : index
    %c160 = arith.constant 160 : index
    %160 = vector.load %arg6[%c0_116, %c160] : memref<8x288xf32, #tpu.memory_space<vmem>>, vector<8x32xf32>
    tpu.vector_store %arg6[%c0_116, %c160], %159 {strides = array<i32>} : memref<8x288xf32, #tpu.memory_space<vmem>>, vector<8x32xf32>,
    %cst_117 = arith.constant 0.000000e+00 : f32
    %161 = vector.broadcast %cst_117 : f32 to vector<8x32xf32>
    %162 = arith.cmpf ogt, %152, %161 : vector<8x32xf32>
    %cst_118 = arith.constant 2.000000e-01 : f32
    %163 = vector.broadcast %cst_118 : f32 to vector<8x32xf32>
    %164 = arith.mulf %163, %152 : vector<8x32xf32>
    %165 = arith.select %162, %152, %164 : vector<8x32xi1>, vector<8x32xf32>
    %166 = arith.truncf %165 : vector<8x32xf32> to vector<8x32xbf16>
    %c12 = arith.constant 12 : index
    %c0_119 = arith.constant 0 : index
    %c0_120 = arith.constant 0 : index
    %167 = vector.load %arg4[%c12, %c0_119, %c0_120] : memref<16x32x32xbf16, #tpu.memory_space<vmem>>, vector<1x32x32xbf16>
    %168 = vector.shape_cast %167 : vector<1x32x32xbf16> to vector<32x32xbf16>
    %cst_121 = arith.constant dense<0.000000e+00> : vector<8x32xf32>
    %169 = tpu.matmul %166, %168, %cst_121 {dimension_numbers = #tpu.dot_dimension_numbers<[1], [0], [0], [1], [0, 0, 1, 1], [], []>} : vector<8x32xbf16>, vector<32x32xbf16>, vector<8x32xf32> -> vector<8x32xf32>
    %c12_122 = arith.constant 12 : index
    %c0_123 = arith.constant 0 : index
    %c0_124 = arith.constant 0 : index
    %170 = vector.load %arg5[%c12_122, %c0_123, %c0_124] : memref<16x1x32xf32, #tpu.memory_space<vmem>>, vector<1x1x32xf32>
    %171 = vector.shape_cast %170 : vector<1x1x32xf32> to vector<1x32xf32>
    %172 = vector.broadcast %171 : vector<1x32xf32> to vector<8x32xf32>
    %173 = arith.addf %169, %172 : vector<8x32xf32>
    %c13 = arith.constant 13 : index
    %c0_125 = arith.constant 0 : index
    %c0_126 = arith.constant 0 : index
    %174 = vector.load %arg4[%c13, %c0_125, %c0_126] : memref<16x32x32xbf16, #tpu.memory_space<vmem>>, vector<1x32x32xbf16>
    %175 = vector.shape_cast %174 : vector<1x32x32xbf16> to vector<32x32xbf16>
    %cst_127 = arith.constant dense<0.000000e+00> : vector<8x32xf32>
    %176 = tpu.matmul %166, %175, %cst_127 {dimension_numbers = #tpu.dot_dimension_numbers<[1], [0], [0], [1], [0, 0, 1, 1], [], []>} : vector<8x32xbf16>, vector<32x32xbf16>, vector<8x32xf32> -> vector<8x32xf32>
    %c13_128 = arith.constant 13 : index
    %c0_129 = arith.constant 0 : index
    %c0_130 = arith.constant 0 : index
    %177 = vector.load %arg5[%c13_128, %c0_129, %c0_130] : memref<16x1x32xf32, #tpu.memory_space<vmem>>, vector<1x1x32xf32>
    %178 = vector.shape_cast %177 : vector<1x1x32xf32> to vector<1x32xf32>
    %179 = vector.broadcast %178 : vector<1x32xf32> to vector<8x32xf32>
    %180 = arith.addf %176, %179 : vector<8x32xf32>
    %c0_131 = arith.constant 0 : index
    %c192 = arith.constant 192 : index
    %181 = vector.load %arg6[%c0_131, %c192] : memref<8x288xf32, #tpu.memory_space<vmem>>, vector<8x32xf32>
    tpu.vector_store %arg6[%c0_131, %c192], %180 {strides = array<i32>} : memref<8x288xf32, #tpu.memory_space<vmem>>, vector<8x32xf32>,
    %cst_132 = arith.constant 0.000000e+00 : f32
    %182 = vector.broadcast %cst_132 : f32 to vector<8x32xf32>
    %183 = arith.cmpf ogt, %173, %182 : vector<8x32xf32>
    %cst_133 = arith.constant 2.000000e-01 : f32
    %184 = vector.broadcast %cst_133 : f32 to vector<8x32xf32>
    %185 = arith.mulf %184, %173 : vector<8x32xf32>
    %186 = arith.select %183, %173, %185 : vector<8x32xi1>, vector<8x32xf32>
    %187 = arith.truncf %186 : vector<8x32xf32> to vector<8x32xbf16>
    %c14 = arith.constant 14 : index
    %c0_134 = arith.constant 0 : index
    %c0_135 = arith.constant 0 : index
    %188 = vector.load %arg4[%c14, %c0_134, %c0_135] : memref<16x32x32xbf16, #tpu.memory_space<vmem>>, vector<1x32x32xbf16>
    %189 = vector.shape_cast %188 : vector<1x32x32xbf16> to vector<32x32xbf16>
    %cst_136 = arith.constant dense<0.000000e+00> : vector<8x32xf32>
    %190 = tpu.matmul %187, %189, %cst_136 {dimension_numbers = #tpu.dot_dimension_numbers<[1], [0], [0], [1], [0, 0, 1, 1], [], []>} : vector<8x32xbf16>, vector<32x32xbf16>, vector<8x32xf32> -> vector<8x32xf32>
    %c14_137 = arith.constant 14 : index
    %c0_138 = arith.constant 0 : index
    %c0_139 = arith.constant 0 : index
    %191 = vector.load %arg5[%c14_137, %c0_138, %c0_139] : memref<16x1x32xf32, #tpu.memory_space<vmem>>, vector<1x1x32xf32>
    %192 = vector.shape_cast %191 : vector<1x1x32xf32> to vector<1x32xf32>
    %193 = vector.broadcast %192 : vector<1x32xf32> to vector<8x32xf32>
    %194 = arith.addf %190, %193 : vector<8x32xf32>
    %c15 = arith.constant 15 : index
    %c0_140 = arith.constant 0 : index
    %c0_141 = arith.constant 0 : index
    %195 = vector.load %arg4[%c15, %c0_140, %c0_141] : memref<16x32x32xbf16, #tpu.memory_space<vmem>>, vector<1x32x32xbf16>
    %196 = vector.shape_cast %195 : vector<1x32x32xbf16> to vector<32x32xbf16>
    %cst_142 = arith.constant dense<0.000000e+00> : vector<8x32xf32>
    %197 = tpu.matmul %187, %196, %cst_142 {dimension_numbers = #tpu.dot_dimension_numbers<[1], [0], [0], [1], [0, 0, 1, 1], [], []>} : vector<8x32xbf16>, vector<32x32xbf16>, vector<8x32xf32> -> vector<8x32xf32>
    %c15_143 = arith.constant 15 : index
    %c0_144 = arith.constant 0 : index
    %c0_145 = arith.constant 0 : index
    %198 = vector.load %arg5[%c15_143, %c0_144, %c0_145] : memref<16x1x32xf32, #tpu.memory_space<vmem>>, vector<1x1x32xf32>
    %199 = vector.shape_cast %198 : vector<1x1x32xf32> to vector<1x32xf32>
    %200 = vector.broadcast %199 : vector<1x32xf32> to vector<8x32xf32>
    %201 = arith.addf %197, %200 : vector<8x32xf32>
    %c0_146 = arith.constant 0 : index
    %c224 = arith.constant 224 : index
    %202 = vector.load %arg6[%c0_146, %c224] : memref<8x288xf32, #tpu.memory_space<vmem>>, vector<8x32xf32>
    tpu.vector_store %arg6[%c0_146, %c224], %201 {strides = array<i32>} : memref<8x288xf32, #tpu.memory_space<vmem>>, vector<8x32xf32>,
    %cst_147 = arith.constant 0.000000e+00 : f32
    %203 = vector.broadcast %cst_147 : f32 to vector<8x32xf32>
    %204 = arith.cmpf ogt, %194, %203 : vector<8x32xf32>
    %cst_148 = arith.constant 2.000000e-01 : f32
    %205 = vector.broadcast %cst_148 : f32 to vector<8x32xf32>
    %206 = arith.mulf %205, %194 : vector<8x32xf32>
    %207 = arith.select %204, %194, %206 : vector<8x32xi1>, vector<8x32xf32>
    %208 = arith.truncf %207 : vector<8x32xf32> to vector<8x32xbf16>
    %c3_149 = arith.constant 3 : index
    %c0_150 = arith.constant 0 : index
    %c0_151 = arith.constant 0 : index
    %209 = vector.load %arg2[%c3_149, %c0_150, %c0_151] : memref<4x32x32xbf16, #tpu.memory_space<vmem>>, vector<1x32x32xbf16>
    %210 = vector.shape_cast %209 : vector<1x32x32xbf16> to vector<32x32xbf16>
    %cst_152 = arith.constant dense<0.000000e+00> : vector<8x32xf32>
    %211 = tpu.matmul %208, %210, %cst_152 {dimension_numbers = #tpu.dot_dimension_numbers<[1], [0], [0], [1], [0, 0, 1, 1], [], []>} : vector<8x32xbf16>, vector<32x32xbf16>, vector<8x32xf32> -> vector<8x32xf32>
    %c3_153 = arith.constant 3 : index
    %c0_154 = arith.constant 0 : index
    %c0_155 = arith.constant 0 : index
    %212 = vector.load %arg3[%c3_153, %c0_154, %c0_155] : memref<4x1x32xf32, #tpu.memory_space<vmem>>, vector<1x1x32xf32>
    %213 = vector.shape_cast %212 : vector<1x1x32xf32> to vector<1x32xf32>
    %214 = vector.broadcast %213 : vector<1x32xf32> to vector<8x32xf32>
    %215 = arith.addf %211, %214 : vector<8x32xf32>
    %c0_156 = arith.constant 0 : index
    %c256 = arith.constant 256 : index
    %216 = vector.load %arg6[%c0_156, %c256] : memref<8x288xf32, #tpu.memory_space<vmem>>, vector<8x32xf32>
    tpu.vector_store %arg6[%c0_156, %c256], %215 {strides = array<i32>} : memref<8x288xf32, #tpu.memory_space<vmem>>, vector<8x32xf32>,
    return
  }
  func.func @transform_0(%arg0: i32) -> (i32, i32) {
    %c0_i32 = arith.constant 0 : i32
    %c0_i32_0 = arith.constant 0 : i32
    return %arg0, %c0_i32 : i32, i32
  }
  func.func @transform_1(%arg0: i32) -> (i32, i32, i32) {
    %c0_i32 = arith.constant 0 : i32
    %c0_i32_0 = arith.constant 0 : i32
    %c0_i32_1 = arith.constant 0 : i32
    %c0_i32_2 = arith.constant 0 : i32
    return %c0_i32, %c0_i32_0, %c0_i32_1 : i32, i32, i32
  }
  func.func @transform_2(%arg0: i32) -> (i32, i32, i32) {
    %c0_i32 = arith.constant 0 : i32
    %c0_i32_0 = arith.constant 0 : i32
    %c0_i32_1 = arith.constant 0 : i32
    %c0_i32_2 = arith.constant 0 : i32
    return %c0_i32, %c0_i32_0, %c0_i32_1 : i32, i32, i32
  }
  func.func @transform_3(%arg0: i32) -> (i32, i32, i32) {
    %c0_i32 = arith.constant 0 : i32
    %c0_i32_0 = arith.constant 0 : i32
    %c0_i32_1 = arith.constant 0 : i32
    %c0_i32_2 = arith.constant 0 : i32
    return %c0_i32, %c0_i32_0, %c0_i32_1 : i32, i32, i32
  }
  func.func @transform_4(%arg0: i32) -> (i32, i32, i32) {
    %c0_i32 = arith.constant 0 : i32
    %c0_i32_0 = arith.constant 0 : i32
    %c0_i32_1 = arith.constant 0 : i32
    %c0_i32_2 = arith.constant 0 : i32
    return %c0_i32, %c0_i32_0, %c0_i32_1 : i32, i32, i32
  }
  func.func @transform_5(%arg0: i32) -> (i32, i32) {
    %c0_i32 = arith.constant 0 : i32
    %c0_i32_0 = arith.constant 0 : i32
    return %arg0, %c0_i32 : i32, i32
  }
}

</mosaic_0001>

<bundles_post_ra>
// kernel: tpu_custom_call.1
= control target key start
LH: loop header
LB: loop body
LE: loop exit
PB: predicated region body
PF: predicated region fallthrough
CT: control target
= control target key end

     0   :  { %10 = vsyncpa [#allocation3], 0  ;;  %s2085_s0 = inlined_call_operand.hbm [shape: f32[16,32], index: 0, kind: input, shape index: {}]   ;;  %s2086_s1 = inlined_call_operand.hbm [shape: bf16[4,32,32], index: 1, kind: input, shape index: {}]   ;;  %s2087_s2 = inlined_call_operand.hbm [shape: f32[4,1,32], index: 2, kind: input, shape index: {}]   ;;  %s2088_s3 = inlined_call_operand.hbm [shape: bf16[16,32,32], index: 3, kind: input, shape index: {}]   ;;  %s2089_s4 = inlined_call_operand.hbm [shape: f32[16,1,32], index: 4, kind: input, shape index: {}]   ;;  %s2090_s5 = inlined_call_operand.hbm [shape: f32[16,288], index: 5, kind: output, shape index: {}]  }
   0x1   :  { %12 = vsyncpa [#allocation3 + $0x1], 0 }
   0x2   :  { %13 = vsyncpa [#allocation6], 0 }
   0x3   :  { %14 = vsyncpa [#allocation9], 0 }
   0x4   :  { %15 = vsyncpa [#allocation4], 0 }
   0x5   :  { %17 = vsyncpa [#allocation4 + $0x1], 0  ;;  %s1870_s18 = smov 0   ;;  %s1872_s19 = smov 0  }
   0x6   :  { %s1874_s20 = smov 0   ;;  %s1876_s21 = smov 0  }
   0x7 LB: > { %s175_s24 = sshll.u32 %s2086_s1, 4  ;;  %s1894_s25 = sadd.s32 4294967295, %s1827_s21   ;;  %s1827_s21 = sphi %s1876_s21, %s2102_s21   ;;  %s1823_s20 = sphi %s1874_s20, %s2101_s20   ;;  %s1819_s19 = sphi %s1872_s19, %s2100_s19   ;;  %s1815_s18 = sphi %s1870_s18, %s2099_s18   ;;  %s176_s24 = int_to_ptr.hbm [resolvable:$true] %s175_s24 }
   0x8   : > { %p1250_p0 = scmp.ge.s32.totalorder %s1827_s21, 1  ;;  %p44_p1 = scmp.eq.s32.totalorder %s1894_s25, 0 }
   0x9   : > { %p164_p2 = scmp.lt.s32.totalorder %s1827_s21, 3  ;;  %s1829_s27 = smov [#allocation5]  }
   0xa   : > { %s177_s28 = sshll.u32 %s1829_s27, 4  ;;  %s203_s6 = sshll.u32 %s2088_s3, 4  ;;  %s178_s28 = int_to_ptr.vmem [resolvable:$true] %s177_s28  ;;  %s204_s6 = int_to_ptr.hbm [resolvable:$true] %s203_s6 }
   0xb   : > { %p1899_p3 = pnand %p1250_p0, %p164_p2  ;;  %s189_s10 = sshll.u32 %s2087_s2, 4  ;;  %s190_s10 = int_to_ptr.hbm [resolvable:$true] %s189_s10 }
   0xc   : > { %s1830_s11 = smov [#allocation8]   ;;  %s1831_s13 = smov 64  }
   0xd   : > { %p1509_p4 = pneg %p1899_p3  ;;  %s205_s12 = sshll.u32 %s1830_s11, 4  ;;  %s206_s12 = int_to_ptr.vmem [resolvable:$true] %s205_s12 }
   0xe   : > { %s1832_s14 = smov 4   ;;  %s1833_s15 = smov [#allocation7]  }
   0xf   : > { %p1911_p6 = pnand %p1509_p4, %p44_p1  ;;  %s191_s16 = sshll.u32 %s1833_s15, 4  ;;  %s192_s16 = int_to_ptr.vmem [resolvable:$true] %s191_s16 }
  0x10   : > { %s217_s23 = sshll.u32 %s2089_s4, 4  ;;  %s1835_s27 = smov 1   ;;  %s218_s23 = int_to_ptr.hbm [resolvable:$true] %s217_s23 }
  0x11   : > { %1512 = dma.hbm_to_vmem [thread:$0]  (!%p1911_p6), %s176_s24, 1024, %s178_s28, [#allocation6], %s1831_s13, %s1831_s13, %s1832_s14  }
  0x12   : > { %1518 = dma.hbm_to_vmem [thread:$0]  (!%p1911_p6), %s204_s6, 4096, %s206_s12, [#allocation9], %s1831_s13, %s1831_s13, %s1832_s14  }
  0x13   : > { %s1834_s24 = smov 16   ;;  %s1836_s28 = smov [#allocation10]  }
  0x14   : > { %1515 = dma.hbm_to_vmem [thread:$0]  (!%p1911_p6), %s190_s10, 64, %s192_s16, [#allocation6], %s1834_s24, %s1834_s24, %s1835_s27  }
  0x15   : > { %s219_s29 = sshll.u32 %s1836_s28, 4  ;;  %s1249_s30 = sadd.s32 4294967294, %s1827_s21   ;;  %s220_s29 = int_to_ptr.vmem [resolvable:$true] %s219_s29 }
  0x16   : > { %1521 = dma.hbm_to_vmem [thread:$0]  (!%p1911_p6), %s218_s23, 256, %s220_s29, [#allocation9], %s1834_s24, %s1834_s24, %s1835_s27  }
  0x17   : > { %s1931_s6 = sadd.s32 1, %s1827_s21   ;;  %s30_s9 = sadd.s32 1, %s1823_s20 }
  0x18   : > { %s27_s8 = ssub.s32 %s1827_s21, %s1931_s6  ;;  %p37_p8 = scmp.ne.s32.totalorder %s1823_s20, %s1819_s19 }
  0x19   : > { %p28_p7 = scmp.eq.s32.totalorder %s27_s8, 0  ;;  %p38_p9 = scmp.eq.s32.totalorder %s1827_s21, 0 }
  0x1a   : > { %p43_p10 = scmp.ne.s32.totalorder %s1819_s19, %s1815_s18  ;;  %p151_p13 = scmp.eq.s32.totalorder %s1894_s25, 1 }
  0x1b   : > { %s1942_s10 = scalar_select %p28_p7, %s1823_s20, %s30_s9  }
  0x1c   : > { %p1944_p11 = por %p38_p9, %p37_p8  ;;  %p1950_p12 = por %p44_p1, %p43_p10 }
  0x1d   : > { %p157_p0 = scmp.eq.s32.totalorder %s1249_s30, 1  ;;  %p1534_p2 = scmp.lt.s32.totalorder %s1827_s21, 2 }
  0x1e   : > { %s233_s12 = sand.u32 1, %s1823_s20   ;;  %p1957_p4 = por %p151_p13, %p37_p8 }
  0x1f   : > { %p1961_p6 = por %p157_p0, %p43_p10  ;;  %s1256_s15 = sshll.u32 %s233_s12, 3 }
  0x20   : > { %s1257_s16 = sshll.u32 %s1827_s21, 3  ;;  %s237_s24 = scalar_lea.vmem [#allocation2], %s1256_s15 }
  0x21   : > { %s241_s23 = scalar_lea.hbm %s2085_s0, %s1257_s16  ;;  %s245_s27 = sshll.u32 %s237_s24, 4  ;;  %s246_s27 = int_to_ptr.vmem [resolvable:$true] %s245_s27 }
  0x22   : > { %s243_s28 = sshll.u32 %s241_s23, 4  ;;  %p1971_p7 = pnand %p1534_p2, %p1944_p11  ;;  %s244_s28 = int_to_ptr.hbm [resolvable:$true] %s243_s28 }
  0x23   : > { %s234_s30 = scalar_lea.sflag [#allocation3], %s233_s12  ;;  %s1723_s8 = sshra.s32 %s244_s28, 4  ;;  %s1724_s8 = int_to_ptr.hbm [resolvable:$true] %s1723_s8 }
  0x24   : > { %s1725_s9 = scalar_lea.hbm %s1724_s8, 8  ;;  %p1727_p9 = pneg %p1971_p7 }
  0x25   : > { %p1726_p8 = scmp.ne.s32.totalorder %s1724_s8, %s1725_s9  ;;  %s1730_s17 = scalar_lea.hbm %s2085_s0, 16 }
  0x26   : > { %p1731_p11 = scmp.lt.s32.totalorder %s1724_s8, %s2085_s0  ;;  %p1732_p0 = scmp.lt.s32.totalorder %s1730_s17, %s1725_s9 }
  0x27   : > { %p1728_p10 = pnand %p1727_p9, %p1726_p8 }
  0x28   : > { %p1733_p2 = por %p1732_p0, %p1731_p11 }
  0x29   : > { %p1729_p13 = pneg %p1728_p10 }
  0x2b   : > { %p1734_p5 = pnand %p1733_p2, %p1729_p13 }
  0x2d   : > { %1737 = shalt.err (!%p1734_p5)
}
  0x2e   : > { %1525 = dma.hbm_to_vmem [thread:$0]  (!%p1971_p7), %s244_s28, 128, %s246_s27, %s234_s30  }
  0x2f   : > { %254 = sbr.rel (%p1899_p3) target bundleno = 1698 (0x6a2), region = 40  ;;  %s1988_s12 = sand.u32 (!%p1899_p3), 1, %s1819_s19  }
  0x30   : > { %s1259_s23 = sshll.u32 (!%p1899_p3), %s1988_s12, 3  ;;  %s257_s24 = scalar_lea.sflag (!%p1899_p3), [#allocation3], %s1988_s12 }
  0x31   : > { %s260_s15 = scalar_lea.vmem (!%p1899_p3), [#allocation2], %s1259_s23 }
  0x34   : > { %1798 = dma.done.wait (%p1950_p12), %s257_s24, 128  }
  0x35   : > { %1800 = vsyncadd (%p1950_p12), %s257_s24, 4294967168 }
  0x36   : > { %1802 = dma.done.wait (%p44_p1), [#allocation6], 1088  }
  0x37   : > { %1804 = vsyncadd (%p44_p1), [#allocation6], 4294966208 }
  0x38   : > { %1806 = dma.done.wait (%p44_p1), [#allocation9], 4352  }
  0x39   : > { %1808 = vsyncadd (%p44_p1), [#allocation9], 4294962944  ;;  %v1448_v0 = vld [vmem:[#allocation5 + $0x8] sm:$0xff]  ;;  %v1447_v1 = vld [vmem:[#allocation5] sm:$0xff]  ;;  %vm331_vm0 = vcmask 261120   ;;  %s1487_s26 = smul.u32 24, %s1988_s12 }
  0x3a   : > { %v309_v2 = vld [vmem:[%s260_s15] sm:$0xff]  ;;  %341 = vmatpush.bf16.msra.mxu0 %v1448_v0  ;;  %v1583_v6 = vld [vmem:[#allocation7] ss:$0 sm:$0xff]  ;;  %v1452_v13 = vld [vmem:[#allocation5 + $0x28] sm:$0xff]  ;;  %s1837_s27 = smov 32   ;;  %vm589_vm6 = vcmask 523520  }
  0x3b   : > { %v310_v3 = vpack.c.bf16 %v309_v2, %v309_v2  ;;  %v1450_v4 = vld [vmem:[#allocation5 + $0x18] sm:$0xff]  ;;  %v1449_v5 = vld [vmem:[#allocation5 + $0x10] sm:$0xff]  ;;  %425 = vmatpush.bf16.msra.mxu2 %v1452_v13  ;;  %v1451_v14 = vld [vmem:[#allocation5 + $0x20] sm:$0xff]  ;;  %s2010_s7 = scalar_lea.vmem [#allocation11], %s1487_s26  ;;  %s1838_s28 = smov 64   ;;  %vm672_vm8 = vcmask 785920  }
  0x3c   : > { %383 = vmatpush.bf16.msra.mxu1 %v1450_v4  ;;  %v1584_v15 = vld [vmem:[#allocation7 + $0x1] ss:$0 sm:$0xff]  ;;  %v1454_v22 = vld [vmem:[#allocation8 + $0x8] sm:$0xff]  ;;  %v1453_v24 = vld [vmem:[#allocation8] sm:$0xff]  ;;  %s1839_s29 = smov 96   ;;  %vm755_vm10 = vcmask 1048320  }
  0x3d   : > { %v1456_v23 = vld [vmem:[#allocation8 + $0x18] sm:$0xff]  ;;  %465 = vmatpush.bf16.msra.mxu3 %v1454_v22  ;;  %v1455_v25 = vld [vmem:[#allocation8 + $0x10] sm:$0xff]  ;;  %v1458_v26 = vld [vmem:[#allocation8 + $0x28] sm:$0xff]  ;;  %s1488_s30 = smul.u32 24, %s1894_s25  ;;  %s1138_s17 = sshll.u32 %s2010_s7, 4  ;;  %s1139_s17 = int_to_ptr.vmem [resolvable:$true] %s1138_s17 }
  0x3e   : > { %342 = vmatpush.bf16.msra.mxu0 %v1447_v1  ;;  %v1585_v27 = vld [vmem:[#allocation7 + $0x2] ss:$0 sm:$0xff]  ;;  %v1457_v35 = vld [vmem:[#allocation8 + $0x20] sm:$0xff]  ;;  %v1459_v36 = vld [vmem:[#allocation8 + $0x30] sm:$0xff]  ;;  %s1125_s11 = scalar_lea.sflag [#allocation4], %s1988_s12  ;;  %s1773_s26 = scalar_lea.hbm %s2090_s5, 48 }
  0x3f   : > { %426 = vmatpush.bf16.msra.mxu2 %v1451_v14  ;;  %v1460_v34 = vld [vmem:[#allocation8 + $0x38] sm:$0xff]  ;;  %v1462_v37 = vld [vmem:[#allocation8 + $0x48] sm:$0xff]  ;;  %v1586_v38 = vld [vmem:[#allocation10 + $0x1] ss:$0 sm:$0xff]  ;;  %s1136_s16 = scalar_lea.hbm %s2090_s5, %s1488_s30 }
  0x40   : > { %384 = vmatpush.bf16.msra.mxu1 %v1449_v5  ;;  %v1587_v41 = vld [vmem:[#allocation10] ss:$0 sm:$0xff]  ;;  %v1464_v49 = vld [vmem:[#allocation8 + $0x58] sm:$0xff]  ;;  %v1463_v51 = vld [vmem:[#allocation8 + $0x50] sm:$0xff]  ;;  %s1140_s22 = sshll.u32 %s1136_s16, 4  ;;  %s1141_s22 = int_to_ptr.hbm [resolvable:$true] %s1140_s22 }
  0x41   : > { %1272 = vmatmul.msk.bf16.vlgmr.msra.gmra.mxu0 %vm331_vm0, %v310_v3  ;;  %466 = vmatpush.bf16.msra.mxu3 %v1453_v24  ;;  %v1461_v50 = vld [vmem:[#allocation8 + $0x40] sm:$0xff]  ;;  %v1466_v63 = vld [vmem:[#allocation8 + $0x68] sm:$0xff]  ;;  %v1468_v0 = vld [vmem:[#allocation8 + $0x78] sm:$0xff]  ;;  %s1767_s23 = sshra.s32 %s1141_s22, 4  ;;  %s1768_s23 = int_to_ptr.hbm [resolvable:$true] %s1767_s23 }
  0x42   : > { %500 = vmatpush.bf16.msrb.mxu0 %v1456_v23  ;;  %v1588_v52 = vld [vmem:[#allocation10 + $0x2] ss:$0 sm:$0xff]  ;;  %v1589_v56 = vld [vmem:[#allocation10 + $0x3] ss:$0 sm:$0xff]  ;;  %v1467_v2 = vld [vmem:[#allocation8 + $0x70] sm:$0xff]  ;;  %s1769_s24 = scalar_lea.hbm %s1768_s23, 24  ;;  %p1774_p12 = scmp.lt.s32.totalorder %s1768_s23, %s2090_s5 }
  0x43   : > { %578 = vmatpush.bf16.msrb.mxu2 %v1460_v34  ;;  %v1465_v1 = vld [vmem:[#allocation8 + $0x60] sm:$0xff]  ;;  %p1770_p1 = scmp.ne.s32.totalorder %s1768_s23, %s1769_s24  ;;  %p1775_p7 = scmp.lt.s32.totalorder %s1773_s26, %s1769_s24 }
  0x44   : > { %543 = vmatpush.bf16.msrb.mxu1 %v1458_v26  ;;  %v1590_v4 = vld [vmem:[#allocation10 + $0x5] ss:$0 sm:$0xff]  ;;  %v1593_v24 = vld [vmem:[#allocation10 + $0x7] ss:$0 sm:$0xff] }
  0x45   : > { %626 = vmatpush.bf16.msrb.mxu3 %v1462_v37  ;;  %v1473_v34 = vld [vmem:[#allocation8 + $0xa0] sm:$0xff]  ;;  %v1594_v37 = vld [vmem:[#allocation10 + $0x9] ss:$0 sm:$0xff]  ;;  %p1771_p3 = pnand %p1770_p1, %p1957_p4  ;;  %p1776_p8 = por %p1775_p7, %p1774_p12 }
  0x46   : > { %501 = vmatpush.bf16.msrb.mxu0 %v1455_v25 }
  0x47   : > { %579 = vmatpush.bf16.msrb.mxu2 %v1459_v36  ;;  %v1478_v36 = vld [vmem:[#allocation8 + $0xc8] sm:$0xff]  ;;  %p1772_p5 = pneg %p1771_p3 }
  0x48   : > { %544 = vmatpush.bf16.msrb.mxu1 %v1457_v35  ;;  %v1475_v35 = vld [vmem:[#allocation8 + $0xb0] sm:$0xff] }
  0x49   : > { %627 = vmatpush.bf16.msrb.mxu3 %v1461_v50  ;;  %v1479_v50 = vld [vmem:[#allocation8 + $0xd0] sm:$0xff]  ;;  %p1777_p9 = pnand %p1776_p8, %p1772_p5 }
  0x4a   : > { %661 = vmatpush.bf16.msra.mxu0 %v1464_v49  ;;  %v1477_v49 = vld [vmem:[#allocation8 + $0xc0] sm:$0xff] }
  0x4e   : > { %662 = vmatpush.bf16.msra.mxu0 %v1463_v51  ;;  %v1596_v51 = vld [vmem:[#allocation10 + $0xa] ss:$0 sm:$0xff] }
  0xbe   : > { %v344_v7 = vpop.f32.mrf.mxu0 }
  0xbf   : > { %v345_v8 = vadd.f32 %v1583_v6, %v344_v7  ;;  %v1591_v7 = vld [vmem:[#allocation10 + $0x4] ss:$0 sm:$0xff] }
  0xc1   : > { %vm348_vm1 = vcmp.gt.f32.partialorder %v345_v8, 0.0  ;;  %v349_v9 = vmul.f32 0.2, %v345_v8 }
  0xc3   : > { %v350_v10 = vsel %vm348_vm1, %v345_v8, %v349_v9 }
  0xc4   : > { %v351_v11 = vpack.c.bf16 %v350_v10, %v350_v10 }
  0xc6   : > { %v346_v12 = vpop.f32.mrf.mxu0  ;;  %1281 = vmatmul.msk.bf16.vlgmr.msra.gmra.mxu1 %vm331_vm0, %v351_v11 }
  0xc7   : > { %709 = vmatpush.bf16.msra.mxu1 %v1466_v63  ;;  %v1484_v63 = vld [vmem:[#allocation8 + $0xf8] sm:$0xff] }
  0xcb   : > { %710 = vmatpush.bf16.msra.mxu1 %v1465_v1  ;;  %v1483_v1 = vld [vmem:[#allocation8 + $0xf0] sm:$0xff] }
 0x143   : > { %v386_v16 = vpop.f32.mrf.mxu1 }
 0x144   : > { %v387_v17 = vadd.f32 %v1584_v15, %v386_v16  ;;  %v1470_v15 = vld [vmem:[#allocation8 + $0x88] sm:$0xff]  ;;  %v1472_v16 = vld [vmem:[#allocation8 + $0x98] sm:$0xff] }
 0x146   : > { %vm390_vm2 = vcmp.gt.f32.partialorder %v387_v17, 0.0  ;;  %v391_v18 = vmul.f32 0.2, %v387_v17 }
 0x148   : > { %v392_v19 = vsel %vm390_vm2, %v387_v17, %v391_v18  ;;  %v1469_v17 = vld [vmem:[#allocation8 + $0x80] sm:$0xff]  ;;  %v1471_v18 = vld [vmem:[#allocation8 + $0x90] sm:$0xff] }
 0x149   : > { %v393_v20 = vpack.c.bf16 %v392_v19, %v392_v19 }
 0x14b   : > { %v388_v21 = vpop.f32.mrf.mxu1  ;;  %1290 = vmatmul.msk.bf16.vlgmr.msra.gmra.mxu2 %vm331_vm0, %v393_v20  ;;  %v1592_v20 = vld [vmem:[#allocation10 + $0x6] ss:$0 sm:$0xff] }
 0x14c   : > { %744 = vmatpush.bf16.msra.mxu2 %v1468_v0  ;;  %v1481_v0 = vld [vmem:[#allocation8 + $0xe0] sm:$0xff] }
 0x150   : > { %745 = vmatpush.bf16.msra.mxu2 %v1467_v2 }
 0x1ce   : > { %v428_v28 = vpop.f32.mrf.mxu2 }
 0x1cf   : > { %v429_v29 = vadd.f32 %v1585_v27, %v428_v28 }
 0x1d1   : > { %vm432_vm3 = vcmp.gt.f32.partialorder %v429_v29, 0.0  ;;  %v433_v30 = vmul.f32 0.2, %v429_v29 }
 0x1d3   : > { %v434_v31 = vsel %vm432_vm3, %v429_v29, %v433_v30 }
 0x1d4   : > { %v435_v32 = vpack.c.bf16 %v434_v31, %v434_v31  ;;  %v1474_v31 = vld [vmem:[#allocation8 + $0xa8] sm:$0xff] }
 0x1d6   : > { %v430_v33 = vpop.f32.mrf.mxu2  ;;  %1299 = vmatmul.msk.bf16.vlgmr.msra.gmra.mxu3 %vm331_vm0, %v435_v32  ;;  %1308 = vmatmul.msk.bf16.vlgmr.msrb.gmra.mxu0 %vm331_vm0, %v435_v32 }
 0x1d7   : > { %792 = vmatpush.bf16.msra.mxu3 %v1470_v15  ;;  %827 = vmatpush.bf16.msrb.mxu0 %v1472_v16  ;;  %v1476_v33 = vld [vmem:[#allocation8 + $0xb8] sm:$0xff]  ;;  %v1485_v15 = vld [vmem:[#allocation5 + $0x30] sm:$0xff] }
 0x1db   : > { %793 = vmatpush.bf16.msra.mxu3 %v1469_v17  ;;  %828 = vmatpush.bf16.msrb.mxu0 %v1471_v18  ;;  %v1600_v17 = vld [vmem:[#allocation10 + $0xe] ss:$0 sm:$0xff] }
 0x253   : > { %v503_v39 = vpop.f32.mrf.mxu0 }
 0x254   : > { %v504_v40 = vadd.f32 %v1586_v38, %v503_v39 }
 0x256   : > { %507 = vst.msk [vmem:[%s2010_s7] sm:$0xff] %vm331_vm0, %v504_v40  ;;  %v1595_v40 = vld [vmem:[#allocation10 + $0x8] ss:$0 sm:$0xff] }
 0x259   : > { %v468_v42 = vpop.f32.mrf.mxu3 }
 0x25a   : > { %v469_v43 = vadd.f32 %v1587_v41, %v468_v42 }
 0x25b   : > { %v505_v44 = vpop.f32.mrf.mxu0 }
 0x25c   : > { %vm508_vm4 = vcmp.gt.f32.partialorder %v469_v43, 0.0  ;;  %v509_v45 = vmul.f32 0.2, %v469_v43 }
 0x25e   : > { %v510_v46 = vsel %vm508_vm4, %v469_v43, %v509_v45 }
 0x25f   : > { %v511_v47 = vpack.c.bf16 %v510_v46, %v510_v46 }
 0x261   : > { %v470_v48 = vpop.f32.mrf.mxu3  ;;  %1317 = vmatmul.msk.bf16.vlgmr.msrb.gmra.mxu1 %vm331_vm0, %v511_v47  ;;  %1326 = vmatmul.msk.bf16.vlgmr.msrb.gmra.mxu2 %vm331_vm0, %v511_v47 }
 0x262   : > { %870 = vmatpush.bf16.msrb.mxu1 %v1474_v31  ;;  %905 = vmatpush.bf16.msrb.mxu2 %v1476_v33  ;;  %v1480_v48 = vld [vmem:[#allocation8 + $0xd8] sm:$0xff] }
 0x266   : > { %871 = vmatpush.bf16.msrb.mxu1 %v1473_v34  ;;  %906 = vmatpush.bf16.msrb.mxu2 %v1475_v35 }
 0x2de   : > { %v546_v53 = vpop.f32.mrf.mxu1 }
 0x2df   : > { %v547_v54 = vadd.f32 %v1588_v52, %v546_v53 }
 0x2e1   : > { %vm591_vm5 = vcmp.gt.f32.partialorder %v547_v54, 0.0  ;;  %v592_v55 = vmul.f32 0.2, %v547_v54 }
 0x2e3   : > { %v593_v57 = vsel %vm591_vm5, %v547_v54, %v592_v55  ;;  %v1597_v55 = vld [vmem:[#allocation10 + $0xb] ss:$0 sm:$0xff] }
 0x2e4   : > { %v594_v58 = vpack.c.bf16 %v593_v57, %v593_v57  ;;  %v581_v59 = vpop.f32.mrf.mxu2 }
 0x2e5   : > { %v582_v60 = vadd.f32 %v1589_v56, %v581_v59 }
 0x2e6   : > { %v548_v61 = vpop.f32.mrf.mxu1  ;;  %1335 = vmatmul.msk.bf16.vlgmr.msrb.gmra.mxu3 %vm331_vm0, %v594_v58  ;;  %1344 = vmatmul.msk.bf16.vlgmr.msra.gmra.mxu0 %vm331_vm0, %v594_v58 }
 0x2e7   : > { %586 = vrot.lane.b32.xlu0 %v582_v60, %s1837_s27  ;;  %952 = vmatpush.bf16.msrb.mxu3 %v1478_v36 }
 0x2e8   : > { %987 = vmatpush.bf16.msra.mxu0 %v1480_v48 }
 0x2eb   : > { %953 = vmatpush.bf16.msrb.mxu3 %v1477_v49 }
 0x2ec   : > { %v583_v62 = vpop.f32.mrf.mxu2  ;;  %988 = vmatpush.bf16.msra.mxu0 %v1479_v50 }
 0x2ed   : > { %v1482_v62 = vld [vmem:[#allocation8 + $0xe8] sm:$0xff] }
 0x359   : > { %v587_v3 = vpop.permute.xlu0 %586 }
 0x35a   : > { %590 = vst.msk [vmem:[%s2010_s7] sm:$0xff] %vm589_vm6, %v587_v3  ;;  %v1598_v3 = vld [vmem:[#allocation10 + $0xd] ss:$0 sm:$0xff] }
 0x363   : > { %v664_v5 = vpop.f32.mrf.mxu0 }
 0x364   : > { %v665_v6 = vadd.f32 %v1590_v4, %v664_v5 }
 0x366   : > { %669 = vrot.lane.b32.xlu1 %v665_v6, %s1838_s28  ;;  %v1599_v6 = vld [vmem:[#allocation10 + $0xc] ss:$0 sm:$0xff] }
 0x369   : > { %v629_v8 = vpop.f32.mrf.mxu3 }
 0x36a   : > { %v630_v9 = vadd.f32 %v1591_v7, %v629_v8 }
 0x36b   : > { %v666_v10 = vpop.f32.mrf.mxu0 }
 0x36c   : > { %vm674_vm7 = vcmp.gt.f32.partialorder %v630_v9, 0.0  ;;  %v675_v11 = vmul.f32 0.2, %v630_v9 }
 0x36e   : > { %v676_v12 = vsel %vm674_vm7, %v630_v9, %v675_v11 }
 0x36f   : > { %v677_v13 = vpack.c.bf16 %v676_v12, %v676_v12 }
 0x371   : > { %v631_v14 = vpop.f32.mrf.mxu3  ;;  %1353 = vmatmul.msk.bf16.vlgmr.msra.gmra.mxu1 %vm331_vm0, %v677_v13  ;;  %1362 = vmatmul.msk.bf16.vlgmr.msra.gmra.mxu2 %vm331_vm0, %v677_v13 }
 0x372   : > { %1034 = vmatpush.bf16.msra.mxu1 %v1482_v62  ;;  %1069 = vmatpush.bf16.msra.mxu2 %v1484_v63  ;;  %v1486_v14 = vld [vmem:[#allocation5 + $0x38] sm:$0xff] }
 0x376   : > { %1035 = vmatpush.bf16.msra.mxu1 %v1481_v0  ;;  %1070 = vmatpush.bf16.msra.mxu2 %v1483_v1 }
 0x3d8   : > { %v670_v19 = vpop.permute.xlu1 %669 }
 0x3d9   : > { %673 = vst.msk [vmem:[%s2010_s7] sm:$0xff] %vm672_vm8, %v670_v19 }
 0x3ee   : > { %v712_v21 = vpop.f32.mrf.mxu1 }
 0x3ef   : > { %v713_v22 = vadd.f32 %v1592_v20, %v712_v21  ;;  %v1601_v21 = vld [vmem:[#allocation10 + $0xf] ss:$0 sm:$0xff] }
 0x3f1   : > { %vm757_vm9 = vcmp.gt.f32.partialorder %v713_v22, 0.0  ;;  %v758_v23 = vmul.f32 0.2, %v713_v22 }
 0x3f3   : > { %v759_v25 = vsel %vm757_vm9, %v713_v22, %v758_v23 }
 0x3f4   : > { %v760_v26 = vpack.c.bf16 %v759_v25, %v759_v25  ;;  %v747_v27 = vpop.f32.mrf.mxu2 }
 0x3f5   : > { %v748_v28 = vadd.f32 %v1593_v24, %v747_v27 }
 0x3f6   : > { %v714_v29 = vpop.f32.mrf.mxu1  ;;  %1371 = vmatmul.msk.bf16.vlgmr.msra.gmra.mxu3 %vm331_vm0, %v760_v26  ;;  %1380 = vmatmul.msk.bf16.vlgmr.msrb.gmra.mxu0 %vm331_vm0, %v760_v26 }
 0x3f7   : > { %752 = vrot.lane.b32.xlu2 %v748_v28, %s1839_s29  ;;  %1116 = vmatpush.bf16.msra.mxu3 %v1486_v14  ;;  %v1602_v29 = vld [vmem:[#allocation7 + $0x3] ss:$0 sm:$0xff] }
 0x3fb   : > { %1117 = vmatpush.bf16.msra.mxu3 %v1485_v15 }
 0x3fc   : > { %v749_v30 = vpop.f32.mrf.mxu2 }
 0x451   : > { %v753_v32 = vpop.permute.xlu2 %752 }
 0x452   : > { %756 = vst.msk [vmem:[%s2010_s7] sm:$0xff] %vm755_vm10, %v753_v32 }
 0x473   : > { %v830_v38 = vpop.f32.mrf.mxu0 }
 0x474   : > { %v831_v39 = vadd.f32 %v1594_v37, %v830_v38 }
 0x476   : > { %834 = vst.msk [vmem:[%s2010_s7 + $0x8] sm:$0xff] %vm331_vm0, %v831_v39 }
 0x479   : > { %v795_v41 = vpop.f32.mrf.mxu3 }
 0x47a   : > { %v796_v42 = vadd.f32 %v1595_v40, %v795_v41 }
 0x47b   : > { %v832_v43 = vpop.f32.mrf.mxu0 }
 0x47c   : > { %vm835_vm11 = vcmp.gt.f32.partialorder %v796_v42, 0.0  ;;  %v836_v44 = vmul.f32 0.2, %v796_v42 }
 0x47e   : > { %v837_v45 = vsel %vm835_vm11, %v796_v42, %v836_v44 }
 0x47f   : > { %v838_v46 = vpack.c.bf16 %v837_v45, %v837_v45 }
 0x481   : > { %v797_v47 = vpop.f32.mrf.mxu3  ;;  %1389 = vmatmul.msk.bf16.vlgmr.msrb.gmra.mxu1 %vm331_vm0, %v838_v46  ;;  %1398 = vmatmul.msk.bf16.vlgmr.msrb.gmra.mxu2 %vm331_vm0, %v838_v46 }
 0x4fe   : > { %v873_v52 = vpop.f32.mrf.mxu1 }
 0x4ff   : > { %v874_v53 = vadd.f32 %v1596_v51, %v873_v52 }
 0x501   : > { %vm917_vm12 = vcmp.gt.f32.partialorder %v874_v53, 0.0  ;;  %v918_v54 = vmul.f32 0.2, %v874_v53 }
 0x503   : > { %v919_v56 = vsel %vm917_vm12, %v874_v53, %v918_v54 }
 0x504   : > { %v920_v57 = vpack.c.bf16 %v919_v56, %v919_v56  ;;  %v908_v58 = vpop.f32.mrf.mxu2 }
 0x505   : > { %v909_v59 = vadd.f32 %v1597_v55, %v908_v58 }
 0x506   : > { %v875_v60 = vpop.f32.mrf.mxu1  ;;  %1407 = vmatmul.msk.bf16.vlgmr.msrb.gmra.mxu3 %vm331_vm0, %v920_v57  ;;  %1416 = vmatmul.msk.bf16.vlgmr.msra.gmra.mxu0 %vm331_vm0, %v920_v57 }
 0x507   : > { %913 = vrot.lane.b32.xlu0 %v909_v59, %s1837_s27 }
 0x50c   : > { %v910_v61 = vpop.f32.mrf.mxu2 }
 0x579   : > { %v914_v2 = vpop.permute.xlu0 %913 }
 0x57a   : > { %916 = vst.msk [vmem:[%s2010_s7 + $0x8] sm:$0xff] %vm589_vm6, %v914_v2 }
 0x583   : > { %v990_v4 = vpop.f32.mrf.mxu0 }
 0x584   : > { %v991_v5 = vadd.f32 %v1598_v3, %v990_v4 }
 0x586   : > { %995 = vrot.lane.b32.xlu1 %v991_v5, %s1838_s28 }
 0x589   : > { %v955_v7 = vpop.f32.mrf.mxu3 }
 0x58a   : > { %v956_v8 = vadd.f32 %v1599_v6, %v955_v7 }
 0x58b   : > { %v992_v9 = vpop.f32.mrf.mxu0 }
 0x58c   : > { %vm999_vm13 = vcmp.gt.f32.partialorder %v956_v8, 0.0  ;;  %v1000_v10 = vmul.f32 0.2, %v956_v8 }
 0x58e   : > { %v1001_v11 = vsel %vm999_vm13, %v956_v8, %v1000_v10 }
 0x58f   : > { %v1002_v12 = vpack.c.bf16 %v1001_v11, %v1001_v11 }
 0x591   : > { %v957_v13 = vpop.f32.mrf.mxu3  ;;  %1425 = vmatmul.msk.bf16.vlgmr.msra.gmra.mxu1 %vm331_vm0, %v1002_v12  ;;  %1434 = vmatmul.msk.bf16.vlgmr.msra.gmra.mxu2 %vm331_vm0, %v1002_v12 }
 0x5f8   : > { %v996_v16 = vpop.permute.xlu1 %995 }
 0x5f9   : > { %998 = vst.msk [vmem:[%s2010_s7 + $0x8] sm:$0xff] %vm672_vm8, %v996_v16 }
 0x60e   : > { %v1037_v18 = vpop.f32.mrf.mxu1 }
 0x60f   : > { %v1038_v19 = vadd.f32 %v1600_v17, %v1037_v18 }
 0x611   : > { %vm1081_vm14 = vcmp.gt.f32.partialorder %v1038_v19, 0.0  ;;  %v1082_v20 = vmul.f32 0.2, %v1038_v19 }
 0x613   : > { %v1083_v22 = vsel %vm1081_vm14, %v1038_v19, %v1082_v20 }
 0x614   : > { %v1084_v23 = vpack.c.bf16 %v1083_v22, %v1083_v22  ;;  %v1072_v24 = vpop.f32.mrf.mxu2 }
 0x615   : > { %v1073_v25 = vadd.f32 %v1601_v21, %v1072_v24 }
 0x616   : > { %v1039_v26 = vpop.f32.mrf.mxu1  ;;  %1443 = vmatmul.msk.bf16.vlgmr.msra.gmra.mxu3 %vm331_vm0, %v1084_v23 }
 0x617   : > { %1077 = vrot.lane.b32.xlu2 %v1073_v25, %s1839_s29 }
 0x61c   : > { %v1074_v27 = vpop.f32.mrf.mxu2 }
 0x671   : > { %v1078_v28 = vpop.permute.xlu2 %1077 }
 0x672   : > { %1080 = vst.msk [vmem:[%s2010_s7 + $0x8] sm:$0xff] %vm755_vm10, %v1078_v28 }
 0x699   : > { %v1119_v30 = vpop.f32.mrf.mxu3 }
 0x69a   : > { %v1120_v31 = vadd.f32 %v1602_v29, %v1119_v30 }
 0x69c   : > { %1123 = vst.msk [vmem:[%s2010_s7 + $0x10] sm:$0xff] %vm331_vm0, %v1120_v31 }
 0x69d   : > { %1780 = shalt.err (!%p1777_p9)
}
 0x69e   : > { %1507 = dma.vmem_to_hbm [thread:$0]  (%p1957_p4), %s1139_s17, 384, %s1141_s22, %s1125_s11  }
 0x6a1   : > { %v1121_v32 = vpop.f32.mrf.mxu3 }
 0x6a2 PF: > { %s1152_s12 = sand.u32 1, %s1815_s18   ;;  %p2098_p10 = scmp.ge.s32.totalorder %s1827_s21, 2 }
 0x6a3   : > { %s1153_s7 = scalar_lea.sflag [#allocation4], %s1152_s12 }
 0x6a4   : > { %p1527_p13 = pnand %p2098_p10, %p1961_p6 }
 0x6a6   : > { %p1528_p11 = pneg %p1527_p13 }
 0x6a8   : > { %1810 = dma.done.wait (%p1528_p11), %s1153_s7, 384  }
 0x6a9   : > { %1812 = vsyncadd (%p1528_p11), %s1153_s7, 4294966912  ;;  %p20_p0 = scmp.ge.s32.totalorder %s1931_s6, 4   ;;  %s2099_s18 = smov %s1819_s19 }
 0x6aa   : > { %s2100_s19 = smov %s1823_s20  ;;  %s2101_s20 = smov %s1942_s10 }
 0x6ab   : > { %s2102_s21 = smov %s1931_s6  ;;  %22 = sbr.rel (!%p20_p0) target bundleno = 7 (0x7), region = 137 }
 0x6b0   :  { %1159 = vsyncpa [#allocation3], 1 }
 0x6b1   :  { %1161 = vsyncpa [#allocation3 + $0x1], 1 }
 0x6b2   :  { %1162 = vsyncpa [#allocation6], 1 }
 0x6b3   :  { %1163 = vsyncpa [#allocation9], 1 }
 0x6b4   :  { %1164 = vsyncpa [#allocation4], 1 }
 0x6b5   :  { %1166 = vsyncpa [#allocation4 + $0x1], 1 }

</bundles_post_ra>
